<compile_context>
chip_gen: v7x
topology: tpu7x:2x2x1
jax: 0.10.0
libtpu: 0.0.40
codegen_flags: <defaults>
</compile_context>

<pallas_src>
import functools

import jax
import jax.numpy as jnp
from jax import lax  # noqa: F401  (kept for parity with other kernels)
from jax.experimental import pallas as pl
from jax.experimental.pallas import tpu as pltpu

EPS = 1e-12  # torch nn.functional.normalize default eps


def _round_up(n, m):
    return ((n + m - 1) // m) * m


def _vmem_capacity_bytes():
    try:
        cap = int(pltpu.get_tpu_info().vmem_capacity_bytes)
        return cap if cap > 0 else (128 << 20)
    except Exception:
        return 128 << 20  # v5e/v6e physical VMEM; conservative fallback


def _normalize_rows(y):
    # Exact epilogue (matches torch normalize: y / max(||y||, eps)).
    sq = jnp.sum(y * y, axis=1, keepdims=True)          # (tb, 1) f32
    inv = 1.0 / jnp.maximum(jnp.sqrt(sq), EPS)
    return y * inv


def _resident_kernel(x_ref, w_ref, b_ref, o_ref, *, compute_dtype):
    x = x_ref[...].astype(compute_dtype)
    y = jnp.dot(x, w_ref[...], preferred_element_type=jnp.float32)
    y = y + b_ref[...]                                    # (tb, D_out_pad) f32
    o_ref[...] = _normalize_rows(y).astype(o_ref.dtype)


def _ktiled_kernel(x_ref, w_ref, b_ref, o_ref, acc_ref, *, compute_dtype):
    k = pl.program_id(1)

    @pl.when(k == 0)
    def _():
        acc_ref[...] = jnp.zeros_like(acc_ref)

    x = x_ref[...].astype(compute_dtype)
    acc_ref[...] += jnp.dot(x, w_ref[...], preferred_element_type=jnp.float32)

    @pl.when(k == pl.num_programs(1) - 1)
    def _():
        y = acc_ref[...] + b_ref[...]
        o_ref[...] = _normalize_rows(y).astype(o_ref.dtype)


def model_with_normalize(x, w, b, *, tile_b=None, tile_k=512,
                         use_bf16_matmul=True, force_k_tiling=False):
    """x: (B, D_in), w: (D_in, D_out), b: (D_out,) -> (B, D_out) with unit-L2 rows."""
    B, D_in = x.shape
    D_out = w.shape[1]
    out_dtype = x.dtype

    # Feed the MXU bf16 (f32 acc); bias/normalize stay in f32.
    compute_dtype = (jnp.bfloat16 if (use_bf16_matmul and x.dtype == jnp.float32)
                     else x.dtype)
    w = w.astype(compute_dtype)

    # Lane-dense output: pad the feature dim to a multiple of 128 with zero
    # weight columns / zero bias (does not perturb the row norms).
    D_out_pad = _round_up(D_out, 128)
    if D_out_pad != D_out:
        w = jnp.pad(w, ((0, 0), (0, D_out_pad - D_out)))
    b_p = jnp.pad(b.astype(jnp.float32), (0, D_out_pad - D_out)).reshape(1, D_out_pad)

    # Batch padded only to the sublane multiple; grid uses cdiv, so the last
    # block may be partial (row-independent op -> garbage rows are dropped).
    sub = 8 if x.dtype.itemsize >= 4 else 16
    B_pad = _round_up(B, sub)

    if tile_b is None:
        tile_b = 512 if D_in < 128 else 256      # tiny-K shapes are DMA-bound
    # Keep at least 2 grid steps so both TensorCores get work on v7x.
    tb = max(sub, min(_round_up(tile_b, sub), _round_up(pl.cdiv(B_pad, 2), sub)))

    vmem_cap = _vmem_capacity_bytes()            # 64 MiB/TC v7x, 128 MiB v5e/v6e
    budget = int(0.8 * vmem_cap)                 # headroom

    w_isz = jnp.dtype(compute_dtype).itemsize
    x_isz = x.dtype.itemsize
    o_isz = jnp.dtype(out_dtype).itemsize

    def resident_bytes(tb_):
        return (D_in * D_out_pad * w_isz          # resident weights (single-buffered)
                + D_out_pad * 4                    # bias
                + 2 * tb_ * D_in * x_isz           # double-buffered x tiles
                + 2 * tb_ * D_out_pad * o_isz      # double-buffered out tiles
                + 2 * tb_ * D_out_pad * 4)         # f32 y + epilogue temporaries

    use_ktiled = force_k_tiling or resident_bytes(tb) > budget // 2

    if not use_ktiled:
        x_p = jnp.pad(x, ((0, B_pad - B), (0, 0))) if B_pad != B else x
        nb = pl.cdiv(B_pad, tb)
        est = resident_bytes(tb)
        vmem_limit = int(min(max(int(1.3 * est) + (4 << 20), 32 << 20), budget))
        out = pl.pallas_call(
            functools.partial(_resident_kernel, compute_dtype=compute_dtype),
            out_shape=jax.ShapeDtypeStruct((B_pad, D_out_pad), out_dtype),
            grid_spec=pltpu.PrefetchScalarGridSpec(
                num_scalar_prefetch=0,
                grid=(nb,),
                in_specs=[
                    pl.BlockSpec((tb, D_in), lambda i: (i, 0)),
                    # Constant index_map -> one resident buffer is enough.
                    pl.BlockSpec((D_in, D_out_pad), lambda i: (0, 0),
                                 pipeline_mode=pl.Buffered(1)),
                    pl.BlockSpec((1, D_out_pad), lambda i: (0, 0),
                                 pipeline_mode=pl.Buffered(1)),
                ],
                out_specs=pl.BlockSpec((tb, D_out_pad), lambda i: (i, 0)),
            ),
            compiler_params=pltpu.CompilerParams(
                # TODO(synk): consider pltpu.CORE_PARALLEL on v7x to guarantee the
                # batch-axis split across the two TensorCores.
                dimension_semantics=("parallel",),
                vmem_limit_bytes=vmem_limit,
            ),
        )(x_p, w, b_p)
    else:
        # K-streaming path: weights too large to sit resident (hits ~2x sooner
        # on v7x's 64 MiB VMEM).  f32 accumulator scratch; bias + normalize
        # under pl.when(k == last).  tk kept a multiple of 128 (256-aligned by
        # default for v6e/v7x MXUs).
        tk = max(128, min(_round_up(tile_k, 128), _round_up(D_in, 128)))

        def ktiled_bytes(tb_, tk_):
            return (2 * tk_ * D_out_pad * w_isz     # double-buffered weight blocks
                    + D_out_pad * 4
                    + 2 * tb_ * tk_ * x_isz
                    + 2 * tb_ * D_out_pad * o_isz
                    + tb_ * D_out_pad * 4            # f32 accumulator scratch
                    + 2 * tb_ * D_out_pad * 4)       # epilogue temporaries

        while ktiled_bytes(tb, tk) > budget and tb > sub:
            tb = max(sub, _round_up(tb // 2, sub))
        while ktiled_bytes(tb, tk) > budget and tk > 128:
            tk = max(128, _round_up(tk // 2, 128))

        D_in_pad = _round_up(D_in, tk)               # K blocks must be exact (reduction)
        nk = D_in_pad // tk
        nb = pl.cdiv(B_pad, tb)
        x_p = (jnp.pad(x, ((0, B_pad - B), (0, D_in_pad - D_in)))
               if (B_pad != B or D_in_pad != D_in) else x)
        w_p = jnp.pad(w, ((0, D_in_pad - D_in), (0, 0))) if D_in_pad != D_in else w
        est = ktiled_bytes(tb, tk)
        vmem_limit = int(min(max(int(1.3 * est) + (4 << 20), 32 << 20), budget))
        out = pl.pallas_call(
            functools.partial(_ktiled_kernel, compute_dtype=compute_dtype),
            out_shape=jax.ShapeDtypeStruct((B_pad, D_out_pad), out_dtype),
            grid_spec=pltpu.PrefetchScalarGridSpec(
                num_scalar_prefetch=0,
                grid=(nb, nk),
                in_specs=[
                    pl.BlockSpec((tb, tk), lambda i, k: (i, k)),
                    pl.BlockSpec((tk, D_out_pad), lambda i, k: (k, 0)),
                    pl.BlockSpec((1, D_out_pad), lambda i, k: (0, 0),
                                 pipeline_mode=pl.Buffered(1)),
                ],
                out_specs=pl.BlockSpec((tb, D_out_pad), lambda i, k: (i, 0)),
                scratch_shapes=[pltpu.VMEM((tb, D_out_pad), jnp.float32)],
            ),
            compiler_params=pltpu.CompilerParams(
                dimension_semantics=("parallel", "arbitrary"),
                vmem_limit_bytes=vmem_limit,
            ),
        )(x_p, w_p, b_p)

    return out[:B, :D_out]


def reference(x, w, b):
    y = x.astype(jnp.float32) @ w.astype(jnp.float32) + b.astype(jnp.float32)
    norm = jnp.sqrt(jnp.sum(y * y, axis=1, keepdims=True))
    return (y / jnp.maximum(norm, EPS)).astype(x.dtype)


if __name__ == "__main__":
    key = jax.random.PRNGKey(0)
    kx, kw, kb, kx2, kw2, kb2 = jax.random.split(key, 6)

    # ---- Case 1: tiny shapes -> resident-weight path. ----
    B, D_in, D_out = 8, 32, 128
    x = jax.random.normal(kx, (B, D_in), dtype=jnp.float32)
    w = jax.random.normal(kw, (D_in, D_out), dtype=jnp.float32) * (1.0 / jnp.sqrt(D_in))
    bias = jax.random.normal(kb, (D_out,), dtype=jnp.float32) * 0.01

    out = jax.block_until_ready(model_with_normalize(x, w, bias))
    ref = reference(x, w, bias)
    assert out.shape == (B, D_out)
    # bf16-fed MXU (f32 accumulation) -> small, benign mismatch vs f32 reference.
    assert jnp.allclose(out, ref, atol=2e-2, rtol=2e-2), "mismatch vs reference (resident)"
    assert jnp.allclose(jnp.linalg.norm(out.astype(jnp.float32), axis=1), 1.0, atol=1e-3)

    # ---- Case 2: K-streamed path + partial last batch block + D_out lane padding. ----
    B2, D_in2, D_out2 = 300, 384, 200
    x2 = jax.random.normal(kx2, (B2, D_in2), dtype=jnp.float32)
    w2 = jax.random.normal(kw2, (D_in2, D_out2), dtype=jnp.float32) * (1.0 / jnp.sqrt(D_in2))
    bias2 = jax.random.normal(kb2, (D_out2,), dtype=jnp.float32) * 0.01

    out2 = jax.block_until_ready(
        model_with_normalize(x2, w2, bias2, tile_b=128, tile_k=128, force_k_tiling=True))
    ref2 = reference(x2, w2, bias2)
    assert out2.shape == (B2, D_out2)
    assert jnp.allclose(out2, ref2, atol=2e-2, rtol=2e-2), "mismatch vs reference (k-tiled)"
    assert jnp.allclose(jnp.linalg.norm(out2.astype(jnp.float32), axis=1), 1.0, atol=1e-3)

    print("KERNEL_OK")
</pallas_src>

<mosaic_0001>
module attributes {stable_mosaic.version = 11 : i64} {
  func.func @_resident_kernel(%arg0: i32, %arg1: memref<8x32xf32, #tpu.memory_space<vmem>>, %arg2: memref<32x128xbf16, #tpu.memory_space<vmem>>, %arg3: memref<1x128xf32, #tpu.memory_space<vmem>>, %arg4: memref<8x128xf32, #tpu.memory_space<vmem>>) attributes {dimension_semantics = [#tpu.dimension_semantics<parallel>], iteration_bounds = array<i64: 1>, scalar_prefetch = 0 : i64, scratch_operands = 0 : i64, tpu.core_type = #tpu.core_type<tc>, window_params = [{transform_indices = @transform_0, window_bounds = array<i64: 8, 32>}, {pipeline_mode = #tpu.pipeline_mode<synchronous>, transform_indices = @transform_1, window_bounds = array<i64: 32, 128>}, {pipeline_mode = #tpu.pipeline_mode<synchronous>, transform_indices = @transform_2, window_bounds = array<i64: 1, 128>}, {transform_indices = @transform_3, window_bounds = array<i64: 8, 128>}]} {
    %c0 = arith.constant 0 : index
    %c0_0 = arith.constant 0 : index
    %0 = vector.load %arg1[%c0, %c0_0] : memref<8x32xf32, #tpu.memory_space<vmem>>, vector<8x32xf32>
    %1 = arith.truncf %0 : vector<8x32xf32> to vector<8x32xbf16>
    %c0_1 = arith.constant 0 : index
    %c0_2 = arith.constant 0 : index
    %2 = vector.load %arg2[%c0_1, %c0_2] : memref<32x128xbf16, #tpu.memory_space<vmem>>, vector<32x128xbf16>
    %cst = arith.constant dense<0.000000e+00> : vector<8x128xf32>
    %3 = tpu.matmul %1, %2, %cst {dimension_numbers = #tpu.dot_dimension_numbers<[1], [0], [0], [1], [0, 0, 1, 1], [], []>} : vector<8x32xbf16>, vector<32x128xbf16>, vector<8x128xf32> -> vector<8x128xf32>
    %c0_3 = arith.constant 0 : index
    %c0_4 = arith.constant 0 : index
    %4 = vector.load %arg3[%c0_3, %c0_4] : memref<1x128xf32, #tpu.memory_space<vmem>>, vector<1x128xf32>
    %5 = vector.broadcast %4 : vector<1x128xf32> to vector<8x128xf32>
    %6 = arith.addf %3, %5 : vector<8x128xf32>
    %7 = arith.mulf %6, %6 : vector<8x128xf32>
    %cst_5 = arith.constant dense<0.000000e+00> : vector<8xf32>
    %8 = vector.multi_reduction <add>, %7, %cst_5 [1] : vector<8x128xf32> to vector<8xf32>
    %9 = vector.shape_cast %8 : vector<8xf32> to vector<8x1xf32>
    %10 = math.sqrt %9 : vector<8x1xf32>
    %cst_6 = arith.constant 9.99999996E-13 : f32
    %11 = vector.broadcast %cst_6 : f32 to vector<8x1xf32>
    %12 = arith.maximumf %10, %11 : vector<8x1xf32>
    %cst_7 = arith.constant 1.000000e+00 : f32
    %13 = vector.broadcast %cst_7 : f32 to vector<8x1xf32>
    %14 = arith.divf %13, %12 : vector<8x1xf32>
    %15 = vector.broadcast %14 : vector<8x1xf32> to vector<8x128xf32>
    %16 = arith.mulf %6, %15 : vector<8x128xf32>
    %c0_8 = arith.constant 0 : index
    %c0_9 = arith.constant 0 : index
    %17 = vector.load %arg4[%c0_8, %c0_9] : memref<8x128xf32, #tpu.memory_space<vmem>>, vector<8x128xf32>
    tpu.vector_store %arg4[%c0_8, %c0_9], %16 {strides = array<i32>} : memref<8x128xf32, #tpu.memory_space<vmem>>, vector<8x128xf32>,
    return
  }
  func.func @transform_0(%arg0: i32) -> (i32, i32) {
    %c0_i32 = arith.constant 0 : i32
    %c0_i32_0 = arith.constant 0 : i32
    return %arg0, %c0_i32 : i32, i32
  }
  func.func @transform_1(%arg0: i32) -> (i32, i32) {
    %c0_i32 = arith.constant 0 : i32
    %c0_i32_0 = arith.constant 0 : i32
    %c0_i32_1 = arith.constant 0 : i32
    return %c0_i32, %c0_i32_0 : i32, i32
  }
  func.func @transform_2(%arg0: i32) -> (i32, i32) {
    %c0_i32 = arith.constant 0 : i32
    %c0_i32_0 = arith.constant 0 : i32
    %c0_i32_1 = arith.constant 0 : i32
    return %c0_i32, %c0_i32_0 : i32, i32
  }
  func.func @transform_3(%arg0: i32) -> (i32, i32) {
    %c0_i32 = arith.constant 0 : i32
    %c0_i32_0 = arith.constant 0 : i32
    return %arg0, %c0_i32 : i32, i32
  }
}

</mosaic_0001>

<bundles_post_ra>
// kernel: tpu_custom_call.1
= control target key start
LH: loop header
LB: loop body
LE: loop exit
PB: predicated region body
PF: predicated region fallthrough
CT: control target
= control target key end

     0   :  { %8 = vsyncpa [#allocation3], 0  ;;  %s315_s0 = inlined_call_operand.hbm [shape: f32[8,32], index: 0, kind: input, shape index: {}]   ;;  %s316_s1 = inlined_call_operand.hbm [shape: bf16[32,128], index: 1, kind: input, shape index: {}]   ;;  %s317_s2 = inlined_call_operand.vmem [shape: f32[1,128], index: 2, kind: input, shape index: {}]   ;;  %s318_s3 = inlined_call_operand.hbm [shape: f32[8,128], index: 3, kind: output, shape index: {}]  }
   0x1   :  { %9 = vsyncpa [#allocation6], 0 }
   0x2   :  { %10 = vsyncpa [#allocation4], 0  ;;  %s242_s12 = smov [#allocation2]   ;;  %s243_s14 = smov [#allocation5]  }
   0x3   :  { %s17_s13 = sshll.u32 %s242_s12, 4  ;;  %s26_s15 = sshll.u32 %s243_s14, 4  ;;  %s18_s13 = int_to_ptr.vmem [resolvable:$true] %s17_s13  ;;  %s269_s15 = int_to_ptr.vmem [resolvable:$true] %s26_s15 }
   0x4   :  { %s170_s18 = scalar_lea.hbm %s315_s0, 128 }
   0x5   :  { %p171_p0 = scmp.ne.s32.totalorder %s315_s0, %s170_s18  ;;  %p174_p1 = scmp.lt.u32.totalorder %s170_s18, %s315_s0 }
   0x7   :  { %p176_p2 = pnand %p174_p1, %p171_p0 }
   0x9   :  { %179 = shalt.err (!%p176_p2)
}
   0xa   :  { %s180_s23 = scalar_lea.vmem %s18_s13, 128  ;;  %p185_p4 = scmp.lt.s32.totalorder %s18_s13, %s18_s13 }
   0xb   :  { %p181_p3 = scmp.ne.s32.totalorder %s18_s13, %s180_s23  ;;  %p186_p5 = scmp.lt.s32.totalorder %s180_s23, %s180_s23 }
   0xd   :  { %p187_p6 = por %p186_p5, %p185_p4 }
   0xf   :  { %p188_p7 = pnand %p187_p6, %p181_p3 }
  0x11   :  { %191 = shalt.err (!%p188_p7)
}
  0x12   :  { %20 = dma.hbm_to_vmem [thread:$0]  %s315_s0, 128, %s18_s13, [#allocation3]  }
  0x13   :  { %s192_s28 = scalar_lea.hbm %s316_s1, 256 }
  0x14   :  { %p193_p8 = scmp.ne.s32.totalorder %s316_s1, %s192_s28  ;;  %p196_p9 = scmp.lt.u32.totalorder %s192_s28, %s316_s1 }
  0x16   :  { %p198_p10 = pnand %p196_p9, %p193_p8 }
  0x18   :  { %201 = shalt.err (!%p198_p10)
}
  0x19   :  { %s202_s6 = scalar_lea.vmem %s269_s15, 256  ;;  %p207_p12 = scmp.lt.s32.totalorder %s269_s15, %s269_s15 }
  0x1a   :  { %p203_p11 = scmp.ne.s32.totalorder %s269_s15, %s202_s6  ;;  %p208_p13 = scmp.lt.s32.totalorder %s202_s6, %s202_s6 }
  0x1c   :  { %p209_p0 = por %p208_p13, %p207_p12 }
  0x1e   :  { %p210_p1 = pnand %p209_p0, %p203_p11 }
  0x20   :  { %213 = shalt.err (!%p210_p1)
}
  0x21   :  { %s244_s0 = smov 64   ;;  %s245_s7 = smov 4  }
  0x22   :  { %32 = dma.hbm_to_vmem [thread:$0]  %s316_s1, 256, %s269_s15, [#allocation6], %s244_s0, %s244_s0, %s245_s7  }
  0x23   :  { %236 = dma.done.wait [#allocation3], 128  }
  0x24   :  { %237 = vsyncadd [#allocation3], 4294967168 }
  0x25   :  { %238 = dma.done.wait [#allocation6], 256  }
  0x26   :  { %239 = vsyncadd [#allocation6], 4294967040  ;;  %v246_v0 = vmov 0.0   ;;  %vm247_vm0 = vmmov 0   ;;  %v164_v1 = vld [vmem:[#allocation5] sm:$0xff]   ;;  %v165_v2 = vld [vmem:[#allocation5 + $0x8] sm:$0xff]  }
  0x27   :  { %149 = vmatprep.subr.bf16.mxu0 %v246_v0  ;;  %153 = vmatprep.mubr.msk.bf16.mxu0 %vm247_vm0, %v246_v0  ;;  %v42_v3 = vld [vmem:[#allocation2] sm:$0xff]  ;;  %vm67_vm1 = vcmask 261120   ;;  %s248_s1 = smov [#allocation7]  }
  0x28   :  { %150 = vmatpush3.bf16.msra.mxu0 %v164_v1  ;;  %v43_v4 = vpack.c.bf16 %v42_v3, %v42_v3  ;;  %v142_v5 = vld [vmem:[%s317_s2] ss:$0 sm:$0xff]  ;;  %s132_s2 = sshll.u32 %s248_s1, 4  ;;  %s133_s2 = int_to_ptr.vmem [resolvable:$true] %s132_s2 }
  0x29   :  { %151 = vmatprep.subr.bf16.mxu0 %v246_v0  ;;  %s214_s12 = scalar_lea.vmem %s133_s2, 128  ;;  %p219_p3 = scmp.lt.s32.totalorder %s133_s2, %s133_s2 }
  0x2a   :  { %p215_p2 = scmp.ne.s32.totalorder %s133_s2, %s214_s12  ;;  %p220_p4 = scmp.lt.s32.totalorder %s214_s12, %s214_s12 }
  0x2c   :  { %152 = vmatpush3.bf16.msra.mxu0 %v165_v2  ;;  %p221_p5 = por %p220_p4, %p219_p3 }
  0x2e   :  { %p222_p6 = pnand %p221_p5, %p215_p2 }
  0x2f   :  { %154 = vmatmul.mubr.msk.bf16.vlgmr.msra.gmra.mrb[0].mxu0 %vm67_vm1, %v43_v4 }
 0x102   :  { %v105_v6 = vpop.f32.mrb[0].mxu0 }
 0x103   :  { %v106_v7 = vadd.f32 %v142_v5, %v105_v6  ;;  %v155_v8 = vpop.f32.mrb[1].mxu0 }
 0x104   :  { %v108_v9 = vpop.f32.mrb[2].mxu0 }
 0x105   :  { %v156_v10 = vpop.f32.mrb[3].mxu0  ;;  %v111_v11 = vmul.f32 %v106_v7, %v106_v7 }
 0x107   :  { %112 = vadd.xlane.f32.xlu0 %v111_v11 }
 0x194   :  { %v113_v12 = vpop.xlane.xlu0 %112 }
 0x195   :  { %166 = vrsqrt.f32 %v113_v12  ;;  %vm116_vm2 = vcmp.eq.f32.partialorder %v113_v12, inf  ;;  %v119_v15 = vand.u32 2147483648, %v113_v12  ;;  %vm118_vm3 = vcmp.eq.f32.partialorder %v113_v12, 0.0 }
 0x19f   :  { %v167_v13 = vpop.eup %166 }
 0x1a0   :  { %v115_v14 = vmul.f32 %v167_v13, %v113_v12 }
 0x1a2   :  { %v117_v16 = vsel %vm116_vm2, %v113_v12, %v115_v14 }
 0x1a3   :  { %v120_v17 = vsel %vm118_vm3, %v119_v15, %v117_v16 }
 0x1a4   :  { %v121_v18 = vmax.f32 %v120_v17, 1e-12 }
 0x1a6   :  { %168 = vrcp.f32 %v121_v18 }
 0x1b0   :  { %v169_v19 = vpop.eup %168 }
 0x1b1   :  { %v124_v20 = vmul.f32 %v169_v19, %v106_v7 }
 0x1b3   :  { %125 = vst [vmem:[#allocation7] sm:$0xff] %v124_v20 }
 0x1b4   :  { %225 = shalt.err (!%p222_p6)
}
 0x1b5   :  { %s226_s15 = scalar_lea.hbm %s318_s3, 128 }
 0x1b6   :  { %p227_p7 = scmp.ne.s32.totalorder %s318_s3, %s226_s15  ;;  %p230_p8 = scmp.lt.u32.totalorder %s226_s15, %s318_s3 }
 0x1b8   :  { %p232_p9 = pnand %p230_p8, %p227_p7 }
 0x1ba   :  { %235 = shalt.err (!%p232_p9)
}
 0x1bb   :  { %135 = dma.vmem_to_hbm [thread:$0]  %s133_s2, 128, %s318_s3, [#allocation4]  }
 0x1bc   :  { %240 = dma.done.wait [#allocation4], 128  }
 0x1bd   :  { %241 = vsyncadd [#allocation4], 4294967168 }
 0x1be   :  { %139 = vsyncpa [#allocation3], 1 }
 0x1bf   :  { %140 = vsyncpa [#allocation6], 1 }
 0x1c0   :  { %141 = vsyncpa [#allocation4], 1 }

</bundles_post_ra>
